<compile_context>
chip_gen: v6e
topology: v6e:2x2x1
jax: 0.10.0
libtpu: 0.0.40
codegen_flags: <defaults>
</compile_context>

<pallas_src>
import functools

import jax
import jax.numpy as jnp
from jax.experimental import pallas as pl
from jax.experimental.pallas import tpu as pltpu


def _round_up(n: int, m: int) -> int:
    return ((n + m - 1) // m) * m


def _pick_batch_tile(batch: int, tile_b: int):
    """Pick (tm, padded, grid) with tm a multiple of 128 dividing `padded`.

    Minimizes tail waste (padded is just the 128-aligned batch) and guarantees
    grid >= 2 whenever padded >= 256 so both v7x TensorCores get work.
    """
    padded = _round_up(max(batch, 1), 128)
    m = padded // 128                      # number of 128-lane units
    cap = max(1, min(tile_b // 128, m))
    if m >= 2:
        cap = max(1, min(cap, m // 2))     # force >= 2 grid steps (v7x megacore)
    d = max(u for u in range(1, cap + 1) if m % u == 0)
    return d * 128, padded, m // d


def _mlp_feature_major(x, w1, b1, w2, b2, w3, b3, compute_dtype):
    """Feature-major MLP: x is (2, TM) f32, returns (2, TM) f32."""
    # ---- Layer 1: Linear(2, 64) as VPU broadcast-FMAs (K=2 would waste the MXU).
    pre1 = b1                                      # (64, 1) broadcasts over lanes
    for k in range(x.shape[0]):                    # static, unrolled (K = 2)
        pre1 = pre1 + w1[:, k:k + 1] * x[k:k + 1, :]
    h1 = jnp.tanh(pre1.astype(compute_dtype))      # (64, TM)

    # ---- Layer 2: the only real matmul; lane-dense N = TM on the MXU, f32 acc.
    pre2 = jnp.dot(w2.astype(compute_dtype), h1,
                   preferred_element_type=jnp.float32) + b2
    h2 = jnp.tanh(pre2.astype(compute_dtype))      # (64, TM)

    # ---- Layer 3: (2,64) @ (64,TM); N=TM lane-dense -> unmasked vst on store.
    return jnp.dot(w3.astype(compute_dtype), h2,
                   preferred_element_type=jnp.float32) + b3


def _mlp_kernel(x_ref, w1_ref, b1_ref, w2_ref, b2_ref, w3_ref, b3_ref, o_ref,
                *, compute_dtype):
    out = _mlp_feature_major(
        x_ref[...].astype(jnp.float32),
        w1_ref[...], b1_ref[...], w2_ref[...], b2_ref[...],
        w3_ref[...], b3_ref[...], compute_dtype)
    o_ref[...] = out.astype(o_ref.dtype)            # (2, TM), lane-dense


def _rk4_kernel(x_ref, w1_ref, b1_ref, w2_ref, b2_ref, w3_ref, b3_ref,
                o_ref, y_ref, *, dt, compute_dtype):
    """Fused RK4: grid = (batch_tiles, num_steps); state lives in VMEM scratch."""
    step = pl.program_id(1)

    @pl.when(step == 0)
    def _():                                        # load initial state for this tile
        y_ref[...] = x_ref[...].astype(jnp.float32)

    w1, b1 = w1_ref[...], b1_ref[...]
    w2, b2 = w2_ref[...], b2_ref[...]
    w3, b3 = w3_ref[...], b3_ref[...]
    f = lambda y: _mlp_feature_major(y, w1, b1, w2, b2, w3, b3, compute_dtype)

    y = y_ref[...]
    k1 = f(y)
    k2 = f(y + (0.5 * dt) * k1)
    k3 = f(y + (0.5 * dt) * k2)
    k4 = f(y + dt * k3)
    y_new = y + (dt / 6.0) * (k1 + 2.0 * k2 + 2.0 * k3 + k4)
    y_ref[...] = y_new

    @pl.when(step == pl.num_programs(1) - 1)
    def _():                                        # only the final state hits HBM
        o_ref[...] = y_new.astype(o_ref.dtype)


def _resident_specs(arrays, ngrid: int, single_buffer: bool):
    """Constant-index (stay-resident) BlockSpecs for weights/biases."""
    specs = []
    for a in arrays:
        zeros = (0,) * a.ndim
        if ngrid == 1:
            imap = lambda i, _z=zeros: _z
        else:
            imap = lambda i, s, _z=zeros: _z
        if single_buffer:
            # Block index never changes -> one VMEM buffer is enough.
            specs.append(pl.BlockSpec(a.shape, imap, pipeline_mode=pl.Buffered(1)))
        else:
            specs.append(pl.BlockSpec(a.shape, imap))
    return specs


def ode_func_forward_feature_major(t, x_fm, params, *, tile_b: int = 1024,
                                   compute_dtype=jnp.float32):
    """Forward on a feature-major (2, padded) slab; returns (2, padded).

    Repeated callers should keep the state in this layout to avoid the
    per-call pad/transpose/slice/transpose XLA kernels entirely.
    """
    del t
    w1, b1, w2, b2, w3, b3 = params
    in_f, padded = x_fm.shape
    h1_f, h2_f, out_f = w1.shape[0], w2.shape[0], w3.shape[0]
    assert padded % 128 == 0, "feature-major batch axis must be 128-aligned"
    tm, padded_chk, grid = _pick_batch_tile(padded, tile_b)
    assert padded_chk == padded

    itemsize = jnp.dtype(x_fm.dtype).itemsize
    flops = 2 * padded * (in_f * h1_f + h1_f * h2_f + h2_f * out_f)
    transcendentals = padded * (h1_f + h2_f)
    bytes_accessed = itemsize * (
        x_fm.size + w1.size + b1.size + w2.size + b2.size + w3.size + b3.size
        + out_f * padded)

    kernel = functools.partial(_mlp_kernel, compute_dtype=compute_dtype)

    def call(single_buffer):
        return pl.pallas_call(
            kernel,
            out_shape=jax.ShapeDtypeStruct((out_f, padded), x_fm.dtype),
            grid=(grid,),
            in_specs=[pl.BlockSpec((in_f, tm), lambda i: (0, i))]
                     + _resident_specs((w1, b1, w2, b2, w3, b3), 1, single_buffer),
            out_specs=pl.BlockSpec((out_f, tm), lambda i: (0, i)),
            compiler_params=pltpu.CompilerParams(
                dimension_semantics=("parallel",)),   # megacore sharding on v7x
            cost_estimate=pl.CostEstimate(
                flops=flops, transcendentals=transcendentals,
                bytes_accessed=bytes_accessed),
        )(x_fm, w1, b1, w2, b2, w3, b3)

    try:
        return call(True)
    except Exception:                      # pl.Buffered(1) unsupported -> default
        return call(False)


def ode_func_forward(t, x, params, *, tile_b: int = 1024,
                     compute_dtype=jnp.float32):
    """Pallas equivalent of ODEFunc.forward(t, x); batch-major in/out. `t` ignored."""
    del t
    batch = x.shape[0]
    _, padded, _ = _pick_batch_tile(batch, tile_b)
    x_fm = jnp.pad(x.T, ((0, 0), (0, padded - batch)))     # (2, padded)
    out_fm = ode_func_forward_feature_major(None, x_fm, params, tile_b=tile_b,
                                            compute_dtype=compute_dtype)
    return out_fm[:, :batch].T


def ode_rk4_solve(x, params, *, t0: float = 0.0, t1: float = 1.0,
                  num_steps: int = 8, tile_b: int = 1024,
                  compute_dtype=jnp.float32):
    """Fixed-step RK4 solve of dy/dt = net(y): all steps fused in one pallas_call."""
    w1, b1, w2, b2, w3, b3 = params
    batch, in_f = x.shape
    h1_f, h2_f, out_f = w1.shape[0], w2.shape[0], w3.shape[0]
    assert out_f == in_f, "ODE func must preserve the state dimension"
    dt = float(t1 - t0) / num_steps

    tm, padded, batch_tiles = _pick_batch_tile(batch, tile_b)
    x_fm = jnp.pad(x.T, ((0, 0), (0, padded - batch)))      # one transpose per solve

    itemsize = jnp.dtype(x.dtype).itemsize
    per_fwd_flops = 2 * padded * (in_f * h1_f + h1_f * h2_f + h2_f * out_f)
    flops = 4 * num_steps * per_fwd_flops
    transcendentals = 4 * num_steps * padded * (h1_f + h2_f)
    bytes_accessed = itemsize * (
        x_fm.size + w1.size + b1.size + w2.size + b2.size + w3.size + b3.size
        + out_f * padded)                 # state stays in VMEM between steps

    kernel = functools.partial(_rk4_kernel, dt=dt, compute_dtype=compute_dtype)

    def call(single_buffer):
        return pl.pallas_call(
            kernel,
            out_shape=jax.ShapeDtypeStruct((out_f, padded), x.dtype),
            grid=(batch_tiles, num_steps),
            in_specs=[pl.BlockSpec((in_f, tm), lambda i, s: (0, i))]
                     + _resident_specs((w1, b1, w2, b2, w3, b3), 2, single_buffer),
            out_specs=pl.BlockSpec((out_f, tm), lambda i, s: (0, i)),
            scratch_shapes=[pltpu.VMEM((in_f, tm), jnp.float32)],   # carried state
            compiler_params=pltpu.CompilerParams(
                dimension_semantics=("parallel", "arbitrary")),
            cost_estimate=pl.CostEstimate(
                flops=flops, transcendentals=transcendentals,
                bytes_accessed=bytes_accessed),
        )(x_fm, w1, b1, w2, b2, w3, b3)

    try:
        out_fm = call(True)
    except Exception:                      # pl.Buffered(1) unsupported -> default
        out_fm = call(False)
    return out_fm[:, :batch].T


def init_params(key, dtype=jnp.float32):
    """Synthetic params in native PyTorch layout: W is (out, in), b stored (out, 1)."""
    k1, k2, k3, k4, k5, k6 = jax.random.split(key, 6)

    def uniform(k, shape, fan_in):
        bound = fan_in ** -0.5
        return jax.random.uniform(k, shape, dtype, minval=-bound, maxval=bound)

    w1 = uniform(k1, (64, 2), 2)
    b1 = uniform(k2, (64, 1), 2)
    w2 = uniform(k3, (64, 64), 64)
    b2 = uniform(k4, (64, 1), 64)
    w3 = uniform(k5, (2, 64), 64)
    b3 = uniform(k6, (2, 1), 64)
    return (w1, b1, w2, b2, w3, b3)


def _reference_forward(t, x, params):
    del t
    w1, b1, w2, b2, w3, b3 = params
    h1 = jnp.tanh(x @ w1.T + b1.T)
    h2 = jnp.tanh(h1 @ w2.T + b2.T)
    return h2 @ w3.T + b3.T


def _reference_rk4(x, params, dt, num_steps):
    f = lambda y: _reference_forward(None, y, params)
    y = x
    for _ in range(num_steps):
        k1 = f(y)
        k2 = f(y + 0.5 * dt * k1)
        k3 = f(y + 0.5 * dt * k2)
        k4 = f(y + dt * k3)
        y = y + (dt / 6.0) * (k1 + 2.0 * k2 + 2.0 * k3 + k4)
    return y


if __name__ == "__main__":
    key = jax.random.PRNGKey(0)
    kx, kp = jax.random.split(key)
    params = init_params(kp)
    t = jnp.float32(0.0)  # ignored, matching the PyTorch module

    # Small batch (single grid step).
    x_small = jax.random.normal(kx, (8, 2), dtype=jnp.float32)
    out_small = jax.block_until_ready(ode_func_forward(t, x_small, params))
    ref_small = _reference_forward(t, x_small, params)
    assert out_small.shape == (8, 2), out_small.shape
    assert jnp.allclose(out_small, ref_small, atol=1e-5, rtol=1e-5), "small-batch mismatch"

    # Larger, non-multiple batch exercises the batch grid + minimal tail padding
    # (300 -> padded 384, tm=128, grid=3; previously padded to 512).
    x_big = jax.random.normal(kx, (300, 2), dtype=jnp.float32)
    out_big = jax.block_until_ready(ode_func_forward(t, x_big, params))
    ref_big = _reference_forward(t, x_big, params)
    assert out_big.shape == (300, 2), out_big.shape
    assert jnp.allclose(out_big, ref_big, atol=1e-5, rtol=1e-5), "tiled-batch mismatch"

    # Fused RK4 integrator: 8 steps x 4 stages in ONE pallas_call, state resident
    # in VMEM, weights fetched once.  (compute_dtype=jnp.bfloat16 is available
    # for v6e/v7x if the integrator tolerance allows; f32 kept here.)
    y_fused = jax.block_until_ready(
        ode_rk4_solve(x_small, params, t0=0.0, t1=1.0, num_steps=8))
    y_ref = _reference_rk4(x_small, params, dt=1.0 / 8, num_steps=8)
    assert y_fused.shape == (8, 2), y_fused.shape
    assert jnp.allclose(y_fused, y_ref, atol=1e-4, rtol=1e-4), "fused RK4 mismatch"

    print("KERNEL_OK")
</pallas_src>

<mosaic_0001>
module attributes {stable_mosaic.version = 11 : i64} {
  func.func @_mlp_kernel(%arg0: i32, %arg1: memref<2x128xf32, #tpu.memory_space<vmem>>, %arg2: memref<64x2xf32, #tpu.memory_space<vmem>>, %arg3: memref<64x1xf32, #tpu.memory_space<vmem>>, %arg4: memref<64x64xf32, #tpu.memory_space<vmem>>, %arg5: memref<64x1xf32, #tpu.memory_space<vmem>>, %arg6: memref<2x64xf32, #tpu.memory_space<vmem>>, %arg7: memref<2x1xf32, #tpu.memory_space<vmem>>, %arg8: memref<2x128xf32, #tpu.memory_space<vmem>>) attributes {dimension_semantics = [#tpu.dimension_semantics<parallel>], iteration_bounds = array<i64: 1>, scalar_prefetch = 0 : i64, scratch_operands = 0 : i64, tpu.core_type = #tpu.core_type<tc>, window_params = [{transform_indices = @transform_0, window_bounds = array<i64: 2, 128>}, {pipeline_mode = #tpu.pipeline_mode<synchronous>, transform_indices = @transform_1, window_bounds = array<i64: 64, 2>}, {pipeline_mode = #tpu.pipeline_mode<synchronous>, transform_indices = @transform_2, window_bounds = array<i64: 64, 1>}, {pipeline_mode = #tpu.pipeline_mode<synchronous>, transform_indices = @transform_3, window_bounds = array<i64: 64, 64>}, {pipeline_mode = #tpu.pipeline_mode<synchronous>, transform_indices = @transform_4, window_bounds = array<i64: 64, 1>}, {pipeline_mode = #tpu.pipeline_mode<synchronous>, transform_indices = @transform_5, window_bounds = array<i64: 2, 64>}, {pipeline_mode = #tpu.pipeline_mode<synchronous>, transform_indices = @transform_6, window_bounds = array<i64: 2, 1>}, {transform_indices = @transform_7, window_bounds = array<i64: 2, 128>}]} {
    %c0 = arith.constant 0 : index
    %c0_0 = arith.constant 0 : index
    %0 = vector.load %arg1[%c0, %c0_0] : memref<2x128xf32, #tpu.memory_space<vmem>>, vector<2x128xf32>
    %c0_1 = arith.constant 0 : index
    %c0_2 = arith.constant 0 : index
    %1 = vector.load %arg2[%c0_1, %c0_2] : memref<64x2xf32, #tpu.memory_space<vmem>>, vector<64x2xf32>
    %c0_3 = arith.constant 0 : index
    %c0_4 = arith.constant 0 : index
    %2 = vector.load %arg3[%c0_3, %c0_4] : memref<64x1xf32, #tpu.memory_space<vmem>>, vector<64x1xf32>
    %c0_5 = arith.constant 0 : index
    %c0_6 = arith.constant 0 : index
    %3 = vector.load %arg4[%c0_5, %c0_6] : memref<64x64xf32, #tpu.memory_space<vmem>>, vector<64x64xf32>
    %c0_7 = arith.constant 0 : index
    %c0_8 = arith.constant 0 : index
    %4 = vector.load %arg5[%c0_7, %c0_8] : memref<64x1xf32, #tpu.memory_space<vmem>>, vector<64x1xf32>
    %c0_9 = arith.constant 0 : index
    %c0_10 = arith.constant 0 : index
    %5 = vector.load %arg6[%c0_9, %c0_10] : memref<2x64xf32, #tpu.memory_space<vmem>>, vector<2x64xf32>
    %c0_11 = arith.constant 0 : index
    %c0_12 = arith.constant 0 : index
    %6 = vector.load %arg7[%c0_11, %c0_12] : memref<2x1xf32, #tpu.memory_space<vmem>>, vector<2x1xf32>
    %7 = vector.extract_strided_slice %1 {offsets = [0, 0], sizes = [64, 1], strides = [1, 1]} : vector<64x2xf32> to vector<64x1xf32>
    %8 = vector.extract_strided_slice %0 {offsets = [0, 0], sizes = [1, 128], strides = [1, 1]} : vector<2x128xf32> to vector<1x128xf32>
    %9 = vector.broadcast %7 : vector<64x1xf32> to vector<64x128xf32>
    %10 = vector.broadcast %8 : vector<1x128xf32> to vector<64x128xf32>
    %11 = arith.mulf %9, %10 : vector<64x128xf32>
    %12 = vector.broadcast %2 : vector<64x1xf32> to vector<64x128xf32>
    %13 = arith.addf %12, %11 : vector<64x128xf32>
    %14 = vector.extract_strided_slice %1 {offsets = [0, 1], sizes = [64, 1], strides = [1, 1]} : vector<64x2xf32> to vector<64x1xf32>
    %15 = vector.extract_strided_slice %0 {offsets = [1, 0], sizes = [1, 128], strides = [1, 1]} : vector<2x128xf32> to vector<1x128xf32>
    %16 = vector.broadcast %14 : vector<64x1xf32> to vector<64x128xf32>
    %17 = vector.broadcast %15 : vector<1x128xf32> to vector<64x128xf32>
    %18 = arith.mulf %16, %17 : vector<64x128xf32>
    %19 = arith.addf %13, %18 : vector<64x128xf32>
    %20 = math.tanh %19 : vector<64x128xf32>
    %cst = arith.constant dense<0.000000e+00> : vector<64x128xf32>
    %21 = tpu.matmul %3, %20, %cst {dimension_numbers = #tpu.dot_dimension_numbers<[1], [0], [0], [1], [0, 0, 1, 1], [], []>} : vector<64x64xf32>, vector<64x128xf32>, vector<64x128xf32> -> vector<64x128xf32>
    %22 = vector.broadcast %4 : vector<64x1xf32> to vector<64x128xf32>
    %23 = arith.addf %21, %22 : vector<64x128xf32>
    %24 = math.tanh %23 : vector<64x128xf32>
    %cst_13 = arith.constant dense<0.000000e+00> : vector<2x128xf32>
    %25 = tpu.matmul %5, %24, %cst_13 {dimension_numbers = #tpu.dot_dimension_numbers<[1], [0], [0], [1], [0, 0, 1, 1], [], []>} : vector<2x64xf32>, vector<64x128xf32>, vector<2x128xf32> -> vector<2x128xf32>
    %26 = vector.broadcast %6 : vector<2x1xf32> to vector<2x128xf32>
    %27 = arith.addf %25, %26 : vector<2x128xf32>
    %c0_14 = arith.constant 0 : index
    %c0_15 = arith.constant 0 : index
    %28 = vector.load %arg8[%c0_14, %c0_15] : memref<2x128xf32, #tpu.memory_space<vmem>>, vector<2x128xf32>
    tpu.vector_store %arg8[%c0_14, %c0_15], %27 {strides = array<i32>} : memref<2x128xf32, #tpu.memory_space<vmem>>, vector<2x128xf32>,
    return
  }
  func.func @transform_0(%arg0: i32) -> (i32, i32) {
    %c0_i32 = arith.constant 0 : i32
    %c0_i32_0 = arith.constant 0 : i32
    return %c0_i32, %arg0 : i32, i32
  }
  func.func @transform_1(%arg0: i32) -> (i32, i32) {
    %c0_i32 = arith.constant 0 : i32
    %c0_i32_0 = arith.constant 0 : i32
    %c0_i32_1 = arith.constant 0 : i32
    return %c0_i32, %c0_i32_0 : i32, i32
  }
  func.func @transform_2(%arg0: i32) -> (i32, i32) {
    %c0_i32 = arith.constant 0 : i32
    %c0_i32_0 = arith.constant 0 : i32
    %c0_i32_1 = arith.constant 0 : i32
    return %c0_i32, %c0_i32_0 : i32, i32
  }
  func.func @transform_3(%arg0: i32) -> (i32, i32) {
    %c0_i32 = arith.constant 0 : i32
    %c0_i32_0 = arith.constant 0 : i32
    %c0_i32_1 = arith.constant 0 : i32
    return %c0_i32, %c0_i32_0 : i32, i32
  }
  func.func @transform_4(%arg0: i32) -> (i32, i32) {
    %c0_i32 = arith.constant 0 : i32
    %c0_i32_0 = arith.constant 0 : i32
    %c0_i32_1 = arith.constant 0 : i32
    return %c0_i32, %c0_i32_0 : i32, i32
  }
  func.func @transform_5(%arg0: i32) -> (i32, i32) {
    %c0_i32 = arith.constant 0 : i32
    %c0_i32_0 = arith.constant 0 : i32
    %c0_i32_1 = arith.constant 0 : i32
    return %c0_i32, %c0_i32_0 : i32, i32
  }
  func.func @transform_6(%arg0: i32) -> (i32, i32) {
    %c0_i32 = arith.constant 0 : i32
    %c0_i32_0 = arith.constant 0 : i32
    %c0_i32_1 = arith.constant 0 : i32
    return %c0_i32, %c0_i32_0 : i32, i32
  }
  func.func @transform_7(%arg0: i32) -> (i32, i32) {
    %c0_i32 = arith.constant 0 : i32
    %c0_i32_0 = arith.constant 0 : i32
    return %c0_i32, %arg0 : i32, i32
  }
}

module attributes {stable_mosaic.version = 11 : i64} {
  func.func @_mlp_kernel(%arg0: i32, %arg1: memref<2x128xf32, #tpu.memory_space<vmem>>, %arg2: memref<64x2xf32, #tpu.memory_space<vmem>>, %arg3: memref<64x1xf32, #tpu.memory_space<vmem>>, %arg4: memref<64x64xf32, #tpu.memory_space<vmem>>, %arg5: memref<64x1xf32, #tpu.memory_space<vmem>>, %arg6: memref<2x64xf32, #tpu.memory_space<vmem>>, %arg7: memref<2x1xf32, #tpu.memory_space<vmem>>, %arg8: memref<2x128xf32, #tpu.memory_space<vmem>>) attributes {dimension_semantics = [#tpu.dimension_semantics<parallel>], iteration_bounds = array<i64: 1>, scalar_prefetch = 0 : i64, scratch_operands = 0 : i64, tpu.core_type = #tpu.core_type<tc>, window_params = [{transform_indices = @transform_0, window_bounds = array<i64: 2, 128>}, {pipeline_mode = #tpu.pipeline_mode<synchronous>, transform_indices = @transform_1, window_bounds = array<i64: 64, 2>}, {pipeline_mode = #tpu.pipeline_mode<synchronous>, transform_indices = @transform_2, window_bounds = array<i64: 64, 1>}, {pipeline_mode = #tpu.pipeline_mode<synchronous>, transform_indices = @transform_3, window_bounds = array<i64: 64, 64>}, {pipeline_mode = #tpu.pipeline_mode<synchronous>, transform_indices = @transform_4, window_bounds = array<i64: 64, 1>}, {pipeline_mode = #tpu.pipeline_mode<synchronous>, transform_indices = @transform_5, window_bounds = array<i64: 2, 64>}, {pipeline_mode = #tpu.pipeline_mode<synchronous>, transform_indices = @transform_6, window_bounds = array<i64: 2, 1>}, {transform_indices = @transform_7, window_bounds = array<i64: 2, 128>}]} {
    %c0 = arith.constant 0 : index
    %c0_0 = arith.constant 0 : index
    %0 = vector.load %arg1[%c0, %c0_0] : memref<2x128xf32, #tpu.memory_space<vmem>>, vector<2x128xf32>
    %c0_1 = arith.constant 0 : index
    %c0_2 = arith.constant 0 : index
    %1 = vector.load %arg2[%c0_1, %c0_2] : memref<64x2xf32, #tpu.memory_space<vmem>>, vector<64x2xf32>
    %c0_3 = arith.constant 0 : index
    %c0_4 = arith.constant 0 : index
    %2 = vector.load %arg3[%c0_3, %c0_4] : memref<64x1xf32, #tpu.memory_space<vmem>>, vector<64x1xf32>
    %c0_5 = arith.constant 0 : index
    %c0_6 = arith.constant 0 : index
    %3 = vector.load %arg4[%c0_5, %c0_6] : memref<64x64xf32, #tpu.memory_space<vmem>>, vector<64x64xf32>
    %c0_7 = arith.constant 0 : index
    %c0_8 = arith.constant 0 : index
    %4 = vector.load %arg5[%c0_7, %c0_8] : memref<64x1xf32, #tpu.memory_space<vmem>>, vector<64x1xf32>
    %c0_9 = arith.constant 0 : index
    %c0_10 = arith.constant 0 : index
    %5 = vector.load %arg6[%c0_9, %c0_10] : memref<2x64xf32, #tpu.memory_space<vmem>>, vector<2x64xf32>
    %c0_11 = arith.constant 0 : index
    %c0_12 = arith.constant 0 : index
    %6 = vector.load %arg7[%c0_11, %c0_12] : memref<2x1xf32, #tpu.memory_space<vmem>>, vector<2x1xf32>
    %7 = vector.extract_strided_slice %1 {offsets = [0, 0], sizes = [64, 1], strides = [1, 1]} : vector<64x2xf32> to vector<64x1xf32>
    %8 = vector.extract_strided_slice %0 {offsets = [0, 0], sizes = [1, 128], strides = [1, 1]} : vector<2x128xf32> to vector<1x128xf32>
    %9 = vector.broadcast %7 : vector<64x1xf32> to vector<64x128xf32>
    %10 = vector.broadcast %8 : vector<1x128xf32> to vector<64x128xf32>
    %11 = arith.mulf %9, %10 : vector<64x128xf32>
    %12 = vector.broadcast %2 : vector<64x1xf32> to vector<64x128xf32>
    %13 = arith.addf %12, %11 : vector<64x128xf32>
    %14 = vector.extract_strided_slice %1 {offsets = [0, 1], sizes = [64, 1], strides = [1, 1]} : vector<64x2xf32> to vector<64x1xf32>
    %15 = vector.extract_strided_slice %0 {offsets = [1, 0], sizes = [1, 128], strides = [1, 1]} : vector<2x128xf32> to vector<1x128xf32>
    %16 = vector.broadcast %14 : vector<64x1xf32> to vector<64x128xf32>
    %17 = vector.broadcast %15 : vector<1x128xf32> to vector<64x128xf32>
    %18 = arith.mulf %16, %17 : vector<64x128xf32>
    %19 = arith.addf %13, %18 : vector<64x128xf32>
    %20 = math.tanh %19 : vector<64x128xf32>
    %cst = arith.constant dense<0.000000e+00> : vector<64x128xf32>
    %21 = tpu.matmul %3, %20, %cst {dimension_numbers = #tpu.dot_dimension_numbers<[1], [0], [0], [1], [0, 0, 1, 1], [], []>} : vector<64x64xf32>, vector<64x128xf32>, vector<64x128xf32> -> vector<64x128xf32>
    %22 = vector.broadcast %4 : vector<64x1xf32> to vector<64x128xf32>
    %23 = arith.addf %21, %22 : vector<64x128xf32>
    %24 = math.tanh %23 : vector<64x128xf32>
    %cst_13 = arith.constant dense<0.000000e+00> : vector<2x128xf32>
    %25 = tpu.matmul %5, %24, %cst_13 {dimension_numbers = #tpu.dot_dimension_numbers<[1], [0], [0], [1], [0, 0, 1, 1], [], []>} : vector<2x64xf32>, vector<64x128xf32>, vector<2x128xf32> -> vector<2x128xf32>
    %26 = vector.broadcast %6 : vector<2x1xf32> to vector<2x128xf32>
    %27 = arith.addf %25, %26 : vector<2x128xf32>
    %c0_14 = arith.constant 0 : index
    %c0_15 = arith.constant 0 : index
    %28 = vector.load %arg8[%c0_14, %c0_15] : memref<2x128xf32, #tpu.memory_space<vmem>>, vector<2x128xf32>
    tpu.vector_store %arg8[%c0_14, %c0_15], %27 {strides = array<i32>} : memref<2x128xf32, #tpu.memory_space<vmem>>, vector<2x128xf32>,
    return
  }
  func.func @transform_0(%arg0: i32) -> (i32, i32) {
    %c0_i32 = arith.constant 0 : i32
    %c0_i32_0 = arith.constant 0 : i32
    return %c0_i32, %arg0 : i32, i32
  }
  func.func @transform_1(%arg0: i32) -> (i32, i32) {
    %c0_i32 = arith.constant 0 : i32
    %c0_i32_0 = arith.constant 0 : i32
    %c0_i32_1 = arith.constant 0 : i32
    return %c0_i32, %c0_i32_0 : i32, i32
  }
  func.func @transform_2(%arg0: i32) -> (i32, i32) {
    %c0_i32 = arith.constant 0 : i32
    %c0_i32_0 = arith.constant 0 : i32
    %c0_i32_1 = arith.constant 0 : i32
    return %c0_i32, %c0_i32_0 : i32, i32
  }
  func.func @transform_3(%arg0: i32) -> (i32, i32) {
    %c0_i32 = arith.constant 0 : i32
    %c0_i32_0 = arith.constant 0 : i32
    %c0_i32_1 = arith.constant 0 : i32
    return %c0_i32, %c0_i32_0 : i32, i32
  }
  func.func @transform_4(%arg0: i32) -> (i32, i32) {
    %c0_i32 = arith.constant 0 : i32
    %c0_i32_0 = arith.constant 0 : i32
    %c0_i32_1 = arith.constant 0 : i32
    return %c0_i32, %c0_i32_0 : i32, i32
  }
  func.func @transform_5(%arg0: i32) -> (i32, i32) {
    %c0_i32 = arith.constant 0 : i32
    %c0_i32_0 = arith.constant 0 : i32
    %c0_i32_1 = arith.constant 0 : i32
    return %c0_i32, %c0_i32_0 : i32, i32
  }
  func.func @transform_6(%arg0: i32) -> (i32, i32) {
    %c0_i32 = arith.constant 0 : i32
    %c0_i32_0 = arith.constant 0 : i32
    %c0_i32_1 = arith.constant 0 : i32
    return %c0_i32, %c0_i32_0 : i32, i32
  }
  func.func @transform_7(%arg0: i32) -> (i32, i32) {
    %c0_i32 = arith.constant 0 : i32
    %c0_i32_0 = arith.constant 0 : i32
    return %c0_i32, %arg0 : i32, i32
  }
}

</mosaic_0001>

<bundles_post_ra>
// kernel: tpu_custom_call.1
= control target key start
LH: loop header
LB: loop body
LE: loop exit
PB: predicated region body
PF: predicated region fallthrough
CT: control target
= control target key end

     0   :  { %v643_v2 = vmov 0   ;;  %v644_v4 = vmov 1   ;;  %s825_s0 = inlined_call_operand.vmem [shape: f32[2,128], index: 0, kind: input, shape index: {}]   ;;  %s826_s1 = inlined_call_operand.vmem [shape: f32[64,2], index: 1, kind: input, shape index: {}]   ;;  %s827_s2 = inlined_call_operand.vmem [shape: f32[64,1], index: 2, kind: input, shape index: {}]   ;;  %s828_s3 = inlined_call_operand.vmem [shape: f32[64,64], index: 3, kind: input, shape index: {}]   ;;  %s829_s4 = inlined_call_operand.vmem [shape: f32[64,1], index: 4, kind: input, shape index: {}]   ;;  %s830_s5 = inlined_call_operand.vmem [shape: f32[2,64], index: 5, kind: input, shape index: {}]   ;;  %s831_s6 = inlined_call_operand.vmem [shape: f32[2,1], index: 6, kind: input, shape index: {}]   ;;  %s832_s7 = inlined_call_operand.hbm [shape: f32[2,128], index: 7, kind: output, shape index: {}]  }
   0x1   :  { %v43_v0 = vld [vmem:[%s827_s2 + $0x38] sm:$0xff]  ;;  %580 = vset.pattern.permute.xlu1 %v643_v2  ;;  %579 = vset.pattern.permute.xlu0 %v643_v2  ;;  %v34_v3 = vld [vmem:[%s826_s1 + $0x30] sm:$0xff]  ;;  %v33_v5 = vld [vmem:[%s826_s1 + $0x28] sm:$0xff] }
   0x2   :  { %v35_v1 = vld [vmem:[%s826_s1 + $0x38] sm:$0xff]  ;;  %151 = vperm.xlu1 %580, %v43_v0  }
   0x3   :  { %99 = vperm.xlu0 %579, %v35_v1  }
   0x6   :  { %581 = vset.pattern.permute.xlu1 %v644_v4 }
   0x7   :  { %94 = vperm.xlu0 %579, %v34_v3   ;;  %191 = vperm.xlu1 %581, %v35_v1  }
   0x8   :  { %12 = vsyncpa [#allocation3], 0  ;;  %v42_v6 = vld [vmem:[%s827_s2 + $0x30] sm:$0xff]  ;;  %v40_v7 = vld [vmem:[%s827_s2 + $0x20] sm:$0xff]  ;;  %vm262_vm0 = vcmask 523264   ;;  %v102_v28 = vlaneseq  ;;  %vm646_vm1 = vmmov 0  }
   0x9   :  { %v32_v8 = vld [vmem:[%s826_s1 + $0x20] sm:$0xff]  ;;  %v39_v9 = vld [vmem:[%s827_s2 + $0x18] sm:$0xff]  ;;  %v41_v10 = vld [vmem:[%s827_s2 + $0x28] sm:$0xff]  ;;  %s647_s17 = smov [#allocation2]  }
   0xa   :  { %v29_v11 = vld [vmem:[%s826_s1 + $0x8] sm:$0xff]  ;;  %v31_v12 = vld [vmem:[%s826_s1 + $0x18] sm:$0xff]  ;;  %v30_v13 = vld [vmem:[%s826_s1 + $0x10] sm:$0xff]  ;;  %v103_v29 = vshrl.u32 %v102_v28, 7  ;;  %s485_s18 = sshll.u32 %s647_s17, 4  ;;  %s486_s18 = int_to_ptr.vmem [resolvable:$true] %s485_s18 }
   0xb   :  { %89 = vperm.xlu0 %579, %v33_v5   ;;  %582 = vset.pattern.permute.xlu1 %v643_v2  ;;  %v28_v14 = vld [vmem:[%s826_s1] sm:$0xff]  ;;  %v38_v15 = vld [vmem:[%s827_s2 + $0x10] sm:$0xff]  ;;  %v37_v16 = vld [vmem:[%s827_s2 + $0x8] sm:$0xff]  ;;  %s621_s19 = scalar_lea.vmem %s486_s18, 32  ;;  %p626_p1 = scmp.lt.s32.totalorder %s486_s18, %s486_s18 }
   0xc   :  { %146 = vperm.xlu1 %582, %v42_v6   ;;  %v36_v17 = vld [vmem:[%s827_s2] sm:$0xff]  ;;  %v59_v18 = vld [vmem:[%s829_s4 + $0x38] sm:$0xff]  ;;  %v57_v19 = vld [vmem:[%s829_s4 + $0x28] sm:$0xff]  ;;  %v104_v30 = vsub.s32 0, %v103_v29  ;;  %v196_v33 = vsub.s32 1, %v103_v29  ;;  %p622_p0 = scmp.ne.s32.totalorder %s486_s18, %s621_s19  ;;  %p627_p2 = scmp.lt.s32.totalorder %s621_s19, %s621_s19 }
   0xd   :  { %v56_v20 = vld [vmem:[%s829_s4 + $0x20] sm:$0xff]  ;;  %v54_v21 = vld [vmem:[%s829_s4 + $0x10] sm:$0xff]  ;;  %v55_v25 = vld [vmem:[%s829_s4 + $0x18] sm:$0xff] }
   0xe   :  { %v44_v22 = vld [vmem:[%s828_s3] sm:$0xff]  ;;  %v58_v24 = vld [vmem:[%s829_s4 + $0x30] sm:$0xff]  ;;  %v53_v26 = vld [vmem:[%s829_s4 + $0x8] sm:$0xff]  ;;  %p628_p3 = por %p627_p2, %p626_p1 }
   0xf   :  { %136 = vperm.xlu0 %579, %v40_v7   ;;  %543 = vmatprep.mubr.msk.f32.mxu0 %vm262_vm0, %v44_v22  ;;  %v52_v23 = vld [vmem:[%s829_s4] sm:$0xff] }
  0x10   :  { %84 = vperm.xlu1 %582, %v32_v8   ;;  %v61_v27 = vld [vmem:[%s831_s6] sm:$0x3]  ;;  %p629_p4 = pnand %p628_p3, %p622_p0 }
  0x11   :  { %v27_v31 = vld [vmem:[%s825_s0] sm:$0x3] }
  0x12   :  { %v770_v32 = vrot.slane %v27_v31, %v104_v30  ;;  %v773_v37 = vrot.slane %v27_v31, %v196_v33 }
  0x13   :  { %131 = vperm.xlu0 %579, %v39_v9  }
  0x14   :  { %141 = vperm.xlu1 %582, %v41_v10  }
  0x17   :  { %69 = vperm.xlu0 %579, %v29_v11  }
  0x18   :  { %79 = vperm.xlu1 %582, %v31_v12  }
  0x1b   :  { %586 = vset.pattern.permute.xlu0 %v644_v4 }
  0x1c   :  { %187 = vperm.xlu0 %586, %v34_v3   ;;  %583 = vset.pattern.permute.xlu1 %v644_v4 }
  0x1d   :  { %179 = vperm.xlu1 %583, %v32_v8  }
  0x20   :  { %183 = vperm.xlu0 %586, %v33_v5  }
  0x21   :  { %584 = vset.pattern.permute.xlu1 %v643_v2 }
  0x22   :  { %74 = vperm.xlu1 %584, %v30_v13  }
  0x24   :  { %171 = vperm.xlu0 %586, %v30_v13  }
  0x26   :  { %585 = vset.pattern.permute.xlu1 %v644_v4 }
  0x27   :  { %175 = vperm.xlu1 %585, %v31_v12  }
  0x28   :  { %167 = vperm.xlu0 %586, %v29_v11  }
  0x2b   :  { %587 = vset.pattern.permute.xlu1 %v643_v2 }
  0x2c   :  { %163 = vperm.xlu0 %586, %v28_v14   ;;  %126 = vperm.xlu1 %587, %v38_v15  }
  0x30   :  { %588 = vset.pattern.permute.xlu0 %v643_v2  ;;  %64 = vperm.xlu1 %587, %v28_v14  }
  0x31   :  { %254 = vperm.xlu0 %588, %v58_v24  }
  0x34   :  { %121 = vperm.xlu1 %587, %v37_v16  }
  0x35   :  { %239 = vperm.xlu0 %588, %v55_v25  }
  0x38   :  { %116 = vperm.xlu1 %587, %v36_v17  }
  0x39   :  { %229 = vperm.xlu0 %588, %v53_v26  }
  0x3c   :  { %259 = vperm.xlu1 %587, %v59_v18  }
  0x3d   :  { %402 = vperm.xlu0 %588, %v61_v27  }
  0x40   :  { %249 = vperm.xlu1 %587, %v57_v19  }
  0x44   :  { %244 = vperm.xlu1 %587, %v56_v20  }
  0x48   :  { %234 = vperm.xlu1 %587, %v54_v21  }
  0x4c   :  { %224 = vperm.xlu1 %587, %v52_v23  }
  0x7d   :  { %v152_v34 = vpop.permute.xlu1 %151 }
  0x7e   :  { %v100_v35 = vpop.permute.xlu0 %99 }
  0x7f   :  { %v113_v36 = vmul.f32 %v770_v32, %v100_v35 }
  0x81   :  { %v161_v40 = vadd.f32 %v152_v34, %v113_v36  ;;  %v46_v36 = vld [vmem:[%s828_s3 + $0x10] sm:$0xff] }
  0x82   :  { %v95_v38 = vpop.permute.xlu0 %94  ;;  %v192_v39 = vpop.permute.xlu1 %191 }
  0x83   :  { %v205_v41 = vmul.f32 %v773_v37, %v192_v39  ;;  %v112_v50 = vmul.f32 %v770_v32, %v95_v38  ;;  %v48_v38 = vld [vmem:[%s828_s3 + $0x20] sm:$0xff]  ;;  %v49_v39 = vld [vmem:[%s828_s3 + $0x28] sm:$0xff] }
  0x85   :  { %v213_v42 = vadd.f32 %v205_v41, %v161_v40  ;;  %v50_v40 = vld [vmem:[%s828_s3 + $0x30] sm:$0xff]  ;;  %v51_v41 = vld [vmem:[%s828_s3 + $0x38] sm:$0xff] }
  0x86   :  { %v90_v43 = vpop.permute.xlu0 %89 }
  0x87   :  { %589 = vtanh.f32 %v213_v42  ;;  %v147_v44 = vpop.permute.xlu1 %146  ;;  %v111_v58 = vmul.f32 %v770_v32, %v90_v43  ;;  %v645_v42 = vmov 0.0  }
  0x88   :  { %v160_v54 = vadd.f32 %v147_v44, %v112_v50  ;;  %555 = vmatprep.subr.mxu1 %v645_v42  ;;  %571 = vmatprep.mubr.msk.f32.mxu1 %vm646_vm1, %v645_v42 }
  0x8a   :  { %v137_v45 = vpop.permute.xlu0 %136 }
  0x8b   :  { %v85_v46 = vpop.permute.xlu1 %84 }
  0x8c   :  { %v110_v55 = vmul.f32 %v770_v32, %v85_v46 }
  0x8e   :  { %v132_v47 = vpop.permute.xlu0 %131  ;;  %v158_v62 = vadd.f32 %v137_v45, %v110_v55 }
  0x8f   :  { %v142_v48 = vpop.permute.xlu1 %141 }
  0x90   :  { %v159_v63 = vadd.f32 %v142_v48, %v111_v58 }
  0x92   :  { %v70_v49 = vpop.permute.xlu0 %69 }
  0x93   :  { %v80_v51 = vpop.permute.xlu1 %79  ;;  %v107_v20 = vmul.f32 %v770_v32, %v70_v49 }
  0x94   :  { %v590_v52 = vpop.eup %589  ;;  %v109_v4 = vmul.f32 %v770_v32, %v80_v51 }
  0x95   :  { %527 = vmatprep.subr.mxu0 %v590_v52 }
  0x96   :  { %528 = vmatpush3.msra.mxu0 %v590_v52  ;;  %v157_v6 = vadd.f32 %v132_v47, %v109_v4 }
  0x97   :  { %v188_v53 = vpop.permute.xlu0 %187 }
  0x98   :  { %v204_v56 = vmul.f32 %v773_v37, %v188_v53  ;;  %v180_v57 = vpop.permute.xlu1 %179 }
  0x99   :  { %v202_v60 = vmul.f32 %v773_v37, %v180_v57 }
  0x9a   :  { %v212_v59 = vadd.f32 %v204_v56, %v160_v54 }
  0x9b   :  { %v184_v61 = vpop.permute.xlu0 %183  ;;  %v210_v1 = vadd.f32 %v202_v60, %v158_v62 }
  0x9c   :  { %591 = vtanh.f32 %v212_v59  ;;  %v203_v0 = vmul.f32 %v773_v37, %v184_v61 }
  0x9d   :  { %v75_v3 = vpop.permute.xlu1 %74 }
  0x9e   :  { %v211_v2 = vadd.f32 %v203_v0, %v159_v63  ;;  %v108_v10 = vmul.f32 %v770_v32, %v75_v3 }
  0x9f   :  { %v172_v8 = vpop.permute.xlu0 %171 }
  0xa0   :  { %593 = vtanh.f32 %v211_v2  ;;  %v200_v13 = vmul.f32 %v773_v37, %v172_v8 }
  0xa1   :  { %595 = vtanh.f32 %v210_v1 }
  0xa2   :  { %v176_v5 = vpop.permute.xlu1 %175 }
  0xa3   :  { %v201_v7 = vmul.f32 %v773_v37, %v176_v5  ;;  %v168_v16 = vpop.permute.xlu0 %167 }
  0xa4   :  { %v199_v22 = vmul.f32 %v773_v37, %v168_v16 }
  0xa5   :  { %v209_v9 = vadd.f32 %v201_v7, %v157_v6 }
  0xa7   :  { %597 = vtanh.f32 %v209_v9  ;;  %v127_v11 = vpop.permute.xlu1 %126  ;;  %v164_v24 = vpop.permute.xlu0 %163 }
  0xa8   :  { %v156_v14 = vadd.f32 %v127_v11, %v108_v10  ;;  %v198_v29 = vmul.f32 %v773_v37, %v164_v24  ;;  %v47_v37 = vld [vmem:[%s828_s3 + $0x18] sm:$0xff]  ;;  %v60_v10 = vld [vmem:[%s830_s5] sm:$0x3] }
  0xa9   :  { %v592_v12 = vpop.eup %591 }
  0xaa   :  { %529 = vmatprep.subr.mxu0 %v592_v12  ;;  %v208_v15 = vadd.f32 %v200_v13, %v156_v14 }
  0xab   :  { %530 = vmatpush3.msra.mxu0 %v592_v12  ;;  %v65_v17 = vpop.permute.xlu1 %64 }
  0xac   :  { %599 = vtanh.f32 %v208_v15  ;;  %v106_v25 = vmul.f32 %v770_v32, %v65_v17  ;;  %v45_v32 = vld [vmem:[%s828_s3 + $0x8] sm:$0xff]  ;;  %v255_v49 = vpop.permute.xlu0 %254 }
  0xad   :  { %v594_v18 = vpop.eup %593 }
  0xae   :  { %531 = vmatprep.subr.mxu0 %v594_v18  ;;  %v596_v19 = vpop.eup %595 }
  0xaf   :  { %532 = vmatpush3.msra.mxu0 %v594_v18  ;;  %v122_v21 = vpop.permute.xlu1 %121 }
  0xb0   :  { %533 = vmatprep.subr.mxu0 %v596_v19  ;;  %v155_v23 = vadd.f32 %v122_v21, %v107_v20  ;;  %v240_v55 = vpop.permute.xlu0 %239 }
  0xb1   :  { %534 = vmatpush3.msra.mxu0 %v596_v19 }
  0xb2   :  { %v207_v26 = vadd.f32 %v199_v22, %v155_v23 }
  0xb3   :  { %v117_v27 = vpop.permute.xlu1 %116 }
  0xb4   :  { %v598_v28 = vpop.eup %597  ;;  %601 = vtanh.f32 %v207_v26  ;;  %v154_v30 = vadd.f32 %v117_v27, %v106_v25  ;;  %v230_v62 = vpop.permute.xlu0 %229 }
  0xb5   :  { %535 = vmatprep.subr.mxu0 %v598_v28 }
  0xb6   :  { %v206_v31 = vadd.f32 %v198_v29, %v154_v30  ;;  %536 = vmatpush3.msra.mxu0 %v598_v28 }
  0xb7   :  { %v260_v43 = vpop.permute.xlu1 %259 }
  0xb8   :  { %603 = vtanh.f32 %v206_v31  ;;  %v403_v12 = vpop.permute.xlu0 %402 }
  0xb9   :  { %v600_v33 = vpop.eup %599 }
  0xba   :  { %537 = vmatprep.subr.mxu0 %v600_v33 }
  0xbb   :  { %538 = vmatpush3.msra.mxu0 %v600_v33  ;;  %v250_v47 = vpop.permute.xlu1 %249 }
  0xbf   :  { %v245_v52 = vpop.permute.xlu1 %244 }
  0xc1   :  { %v602_v34 = vpop.eup %601 }
  0xc2   :  { %539 = vmatprep.subr.mxu0 %v602_v34 }
  0xc3   :  { %540 = vmatpush3.msra.mxu0 %v602_v34  ;;  %v235_v60 = vpop.permute.xlu1 %234 }
  0xc5   :  { %v604_v35 = vpop.eup %603 }
  0xc6   :  { %541 = vmatprep.subr.mxu0 %v604_v35 }
  0xc7   :  { %542 = vmatpush3.msra.mxu0 %v604_v35  ;;  %v225_v1 = vpop.permute.xlu1 %224 }
  0xc8   :  { %544 = vmatmul.mubr.msk.f32.vlgmr.msra.gmra.mxu0 %vm262_vm0, %v45_v32 }
  0xc9   :  { %546 = vmatprep.mubr.msk.f32.mxu0 %vm262_vm0, %v46_v36 }
  0xcc   :  { %547 = vmatmul.mubr.msk.f32.gmra.mxu0 %vm262_vm0, %v47_v37 }
  0xcd   :  { %549 = vmatprep.mubr.msk.f32.mxu0 %vm262_vm0, %v48_v38 }
  0xd0   :  { %550 = vmatmul.mubr.msk.f32.gmra.mxu0 %vm262_vm0, %v49_v39 }
  0xd1   :  { %552 = vmatprep.mubr.msk.f32.mxu0 %vm262_vm0, %v50_v40 }
  0xd4   :  { %553 = vmatmul.mubr.msk.f32.gmra.mxu0 %vm262_vm0, %v51_v41 }
 0x188   :  { %v545_v44 = vpop.f32.mrf.mxu0 }
 0x189   :  { %v359_v0 = vadd.f32 %v545_v44, %v230_v62 }
 0x18a   :  { %v353_v45 = vpop.f32.mrf.mxu0 }
 0x18b   :  { %v354_v2 = vadd.f32 %v353_v45, %v225_v1 }
 0x18c   :  { %v548_v46 = vpop.f32.mrf.mxu0 }
 0x18d   :  { %v369_v61 = vadd.f32 %v548_v46, %v240_v55 }
 0x18e   :  { %v363_v48 = vpop.f32.mrf.mxu0 }
 0x18f   :  { %v364_v63 = vadd.f32 %v363_v48, %v235_v60 }
 0x190   :  { %v551_v50 = vpop.f32.mrf.mxu0 }
 0x191   :  { %v379_v57 = vadd.f32 %v551_v50, %v250_v47 }
 0x192   :  { %v373_v51 = vpop.f32.mrf.mxu0 }
 0x193   :  { %v374_v59 = vadd.f32 %v373_v51, %v245_v52 }
 0x194   :  { %v554_v53 = vpop.f32.mrf.mxu0 }
 0x195   :  { %v389_v54 = vadd.f32 %v554_v53, %v260_v43 }
 0x196   :  { %v383_v56 = vpop.f32.mrf.mxu0 }
 0x197   :  { %605 = vtanh.f32 %v389_v54  ;;  %v384_v58 = vadd.f32 %v383_v56, %v255_v49 }
 0x199   :  { %607 = vtanh.f32 %v384_v58 }
 0x19a   :  { %609 = vtanh.f32 %v379_v57 }
 0x19b   :  { %611 = vtanh.f32 %v374_v59 }
 0x19c   :  { %613 = vtanh.f32 %v369_v61 }
 0x19d   :  { %615 = vtanh.f32 %v364_v63 }
 0x19e   :  { %617 = vtanh.f32 %v359_v0 }
 0x19f   :  { %619 = vtanh.f32 %v354_v2 }
 0x1a4   :  { %v606_v3 = vpop.eup %605 }
 0x1a5   :  { %556 = vmatpush3.msra.mxu1 %v606_v3 }
 0x1a6   :  { %v608_v4 = vpop.eup %607  ;;  %557 = vmatprep.subr.mxu1 %v645_v42 }
 0x1a7   :  { %558 = vmatpush3.msra.mxu1 %v608_v4  ;;  %v610_v5 = vpop.eup %609 }
 0x1a8   :  { %559 = vmatprep.subr.mxu1 %v645_v42  ;;  %v612_v6 = vpop.eup %611 }
 0x1a9   :  { %560 = vmatpush3.msra.mxu1 %v610_v5  ;;  %v614_v7 = vpop.eup %613 }
 0x1aa   :  { %561 = vmatprep.subr.mxu1 %v645_v42  ;;  %v616_v8 = vpop.eup %615 }
 0x1ab   :  { %562 = vmatpush3.msra.mxu1 %v612_v6  ;;  %v618_v9 = vpop.eup %617 }
 0x1ac   :  { %563 = vmatprep.subr.mxu1 %v645_v42  ;;  %v620_v11 = vpop.eup %619 }
 0x1ad   :  { %564 = vmatpush3.msra.mxu1 %v614_v7 }
 0x1ae   :  { %565 = vmatprep.subr.mxu1 %v645_v42 }
 0x1af   :  { %566 = vmatpush3.msra.mxu1 %v616_v8 }
 0x1b0   :  { %567 = vmatprep.subr.mxu1 %v645_v42 }
 0x1b1   :  { %568 = vmatpush3.msra.mxu1 %v618_v9 }
 0x1b2   :  { %569 = vmatprep.subr.mxu1 %v645_v42 }
 0x1b3   :  { %570 = vmatpush3.msra.mxu1 %v620_v11 }
 0x1b4   :  { %572 = vmatmul.mubr.msk.f32.vlgmr.msra.gmra.mxu1 %vm262_vm0, %v60_v10 }
 0x274   :  { %v474_v13 = vpop.f32.mrf.mxu1 }
 0x275   :  { %v475_v14 = vadd.f32 %v474_v13, %v403_v12 }
 0x276   :  { %v573_v15 = vpop.f32.mrf.mxu1 }
 0x277   :  { %478 = vst [vmem:[#allocation2] sm:$0x3] %v475_v14 }
 0x278   :  { %632 = shalt.err (!%p629_p4)
}
 0x279   :  { %488 = dma.vmem_to_hbm [thread:$0]  %s486_s18, 32, %s832_s7, [#allocation3]  }
 0x27a   :  { %641 = dma.done.wait [#allocation3], 32  }
 0x27b   :  { %642 = vsyncadd [#allocation3], 4294967264 }
 0x27c   :  { %492 = vsyncpa [#allocation3], 1 }

// kernel: tpu_custom_call.1
= control target key start
LH: loop header
LB: loop body
LE: loop exit
PB: predicated region body
PF: predicated region fallthrough
CT: control target
= control target key end

     0   :  { %v643_v2 = vmov 0   ;;  %v644_v4 = vmov 1   ;;  %s825_s0 = inlined_call_operand.vmem [shape: f32[2,128], index: 0, kind: input, shape index: {}]   ;;  %s826_s1 = inlined_call_operand.vmem [shape: f32[64,2], index: 1, kind: input, shape index: {}]   ;;  %s827_s2 = inlined_call_operand.vmem [shape: f32[64,1], index: 2, kind: input, shape index: {}]   ;;  %s828_s3 = inlined_call_operand.vmem [shape: f32[64,64], index: 3, kind: input, shape index: {}]   ;;  %s829_s4 = inlined_call_operand.vmem [shape: f32[64,1], index: 4, kind: input, shape index: {}]   ;;  %s830_s5 = inlined_call_operand.vmem [shape: f32[2,64], index: 5, kind: input, shape index: {}]   ;;  %s831_s6 = inlined_call_operand.vmem [shape: f32[2,1], index: 6, kind: input, shape index: {}]   ;;  %s832_s7 = inlined_call_operand.hbm [shape: f32[2,128], index: 7, kind: output, shape index: {}]  }
   0x1   :  { %v43_v0 = vld [vmem:[%s827_s2 + $0x38] sm:$0xff]  ;;  %580 = vset.pattern.permute.xlu1 %v643_v2  ;;  %579 = vset.pattern.permute.xlu0 %v643_v2  ;;  %v34_v3 = vld [vmem:[%s826_s1 + $0x30] sm:$0xff]  ;;  %v33_v5 = vld [vmem:[%s826_s1 + $0x28] sm:$0xff] }
   0x2   :  { %v35_v1 = vld [vmem:[%s826_s1 + $0x38] sm:$0xff]  ;;  %151 = vperm.xlu1 %580, %v43_v0  }
   0x3   :  { %99 = vperm.xlu0 %579, %v35_v1  }
   0x6   :  { %581 = vset.pattern.permute.xlu1 %v644_v4 }
   0x7   :  { %94 = vperm.xlu0 %579, %v34_v3   ;;  %191 = vperm.xlu1 %581, %v35_v1  }
   0x8   :  { %12 = vsyncpa [#allocation3], 0  ;;  %v42_v6 = vld [vmem:[%s827_s2 + $0x30] sm:$0xff]  ;;  %v40_v7 = vld [vmem:[%s827_s2 + $0x20] sm:$0xff]  ;;  %vm262_vm0 = vcmask 523264   ;;  %v102_v28 = vlaneseq  ;;  %vm646_vm1 = vmmov 0  }
   0x9   :  { %v32_v8 = vld [vmem:[%s826_s1 + $0x20] sm:$0xff]  ;;  %v39_v9 = vld [vmem:[%s827_s2 + $0x18] sm:$0xff]  ;;  %v41_v10 = vld [vmem:[%s827_s2 + $0x28] sm:$0xff]  ;;  %s647_s17 = smov [#allocation2]  }
   0xa   :  { %v29_v11 = vld [vmem:[%s826_s1 + $0x8] sm:$0xff]  ;;  %v31_v12 = vld [vmem:[%s826_s1 + $0x18] sm:$0xff]  ;;  %v30_v13 = vld [vmem:[%s826_s1 + $0x10] sm:$0xff]  ;;  %v103_v29 = vshrl.u32 %v102_v28, 7  ;;  %s485_s18 = sshll.u32 %s647_s17, 4  ;;  %s486_s18 = int_to_ptr.vmem [resolvable:$true] %s485_s18 }
   0xb   :  { %89 = vperm.xlu0 %579, %v33_v5   ;;  %582 = vset.pattern.permute.xlu1 %v643_v2  ;;  %v28_v14 = vld [vmem:[%s826_s1] sm:$0xff]  ;;  %v38_v15 = vld [vmem:[%s827_s2 + $0x10] sm:$0xff]  ;;  %v37_v16 = vld [vmem:[%s827_s2 + $0x8] sm:$0xff]  ;;  %s621_s19 = scalar_lea.vmem %s486_s18, 32  ;;  %p626_p1 = scmp.lt.s32.totalorder %s486_s18, %s486_s18 }
   0xc   :  { %146 = vperm.xlu1 %582, %v42_v6   ;;  %v36_v17 = vld [vmem:[%s827_s2] sm:$0xff]  ;;  %v59_v18 = vld [vmem:[%s829_s4 + $0x38] sm:$0xff]  ;;  %v57_v19 = vld [vmem:[%s829_s4 + $0x28] sm:$0xff]  ;;  %v104_v30 = vsub.s32 0, %v103_v29  ;;  %v196_v33 = vsub.s32 1, %v103_v29  ;;  %p622_p0 = scmp.ne.s32.totalorder %s486_s18, %s621_s19  ;;  %p627_p2 = scmp.lt.s32.totalorder %s621_s19, %s621_s19 }
   0xd   :  { %v56_v20 = vld [vmem:[%s829_s4 + $0x20] sm:$0xff]  ;;  %v54_v21 = vld [vmem:[%s829_s4 + $0x10] sm:$0xff]  ;;  %v55_v25 = vld [vmem:[%s829_s4 + $0x18] sm:$0xff] }
   0xe   :  { %v44_v22 = vld [vmem:[%s828_s3] sm:$0xff]  ;;  %v58_v24 = vld [vmem:[%s829_s4 + $0x30] sm:$0xff]  ;;  %v53_v26 = vld [vmem:[%s829_s4 + $0x8] sm:$0xff]  ;;  %p628_p3 = por %p627_p2, %p626_p1 }
   0xf   :  { %136 = vperm.xlu0 %579, %v40_v7   ;;  %543 = vmatprep.mubr.msk.f32.mxu0 %vm262_vm0, %v44_v22  ;;  %v52_v23 = vld [vmem:[%s829_s4] sm:$0xff] }
  0x10   :  { %84 = vperm.xlu1 %582, %v32_v8   ;;  %v61_v27 = vld [vmem:[%s831_s6] sm:$0x3]  ;;  %p629_p4 = pnand %p628_p3, %p622_p0 }
  0x11   :  { %v27_v31 = vld [vmem:[%s825_s0] sm:$0x3] }
  0x12   :  { %v770_v32 = vrot.slane %v27_v31, %v104_v30  ;;  %v773_v37 = vrot.slane %v27_v31, %v196_v33 }
  0x13   :  { %131 = vperm.xlu0 %579, %v39_v9  }
  0x14   :  { %141 = vperm.xlu1 %582, %v41_v10  }
  0x17   :  { %69 = vperm.xlu0 %579, %v29_v11  }
  0x18   :  { %79 = vperm.xlu1 %582, %v31_v12  }
  0x1b   :  { %586 = vset.pattern.permute.xlu0 %v644_v4 }
  0x1c   :  { %187 = vperm.xlu0 %586, %v34_v3   ;;  %583 = vset.pattern.permute.xlu1 %v644_v4 }
  0x1d   :  { %179 = vperm.xlu1 %583, %v32_v8  }
  0x20   :  { %183 = vperm.xlu0 %586, %v33_v5  }
  0x21   :  { %584 = vset.pattern.permute.xlu1 %v643_v2 }
  0x22   :  { %74 = vperm.xlu1 %584, %v30_v13  }
  0x24   :  { %171 = vperm.xlu0 %586, %v30_v13  }
  0x26   :  { %585 = vset.pattern.permute.xlu1 %v644_v4 }
  0x27   :  { %175 = vperm.xlu1 %585, %v31_v12  }
  0x28   :  { %167 = vperm.xlu0 %586, %v29_v11  }
  0x2b   :  { %587 = vset.pattern.permute.xlu1 %v643_v2 }
  0x2c   :  { %163 = vperm.xlu0 %586, %v28_v14   ;;  %126 = vperm.xlu1 %587, %v38_v15  }
  0x30   :  { %588 = vset.pattern.permute.xlu0 %v643_v2  ;;  %64 = vperm.xlu1 %587, %v28_v14  }
  0x31   :  { %254 = vperm.xlu0 %588, %v58_v24  }
  0x34   :  { %121 = vperm.xlu1 %587, %v37_v16  }
  0x35   :  { %239 = vperm.xlu0 %588, %v55_v25  }
  0x38   :  { %116 = vperm.xlu1 %587, %v36_v17  }
  0x39   :  { %229 = vperm.xlu0 %588, %v53_v26  }
  0x3c   :  { %259 = vperm.xlu1 %587, %v59_v18  }
  0x3d   :  { %402 = vperm.xlu0 %588, %v61_v27  }
  0x40   :  { %249 = vperm.xlu1 %587, %v57_v19  }
  0x44   :  { %244 = vperm.xlu1 %587, %v56_v20  }
  0x48   :  { %234 = vperm.xlu1 %587, %v54_v21  }
  0x4c   :  { %224 = vperm.xlu1 %587, %v52_v23  }
  0x7d   :  { %v152_v34 = vpop.permute.xlu1 %151 }
  0x7e   :  { %v100_v35 = vpop.permute.xlu0 %99 }
  0x7f   :  { %v113_v36 = vmul.f32 %v770_v32, %v100_v35 }
  0x81   :  { %v161_v40 = vadd.f32 %v152_v34, %v113_v36  ;;  %v46_v36 = vld [vmem:[%s828_s3 + $0x10] sm:$0xff] }
  0x82   :  { %v95_v38 = vpop.permute.xlu0 %94  ;;  %v192_v39 = vpop.permute.xlu1 %191 }
  0x83   :  { %v205_v41 = vmul.f32 %v773_v37, %v192_v39  ;;  %v112_v50 = vmul.f32 %v770_v32, %v95_v38  ;;  %v48_v38 = vld [vmem:[%s828_s3 + $0x20] sm:$0xff]  ;;  %v49_v39 = vld [vmem:[%s828_s3 + $0x28] sm:$0xff] }
  0x85   :  { %v213_v42 = vadd.f32 %v205_v41, %v161_v40  ;;  %v50_v40 = vld [vmem:[%s828_s3 + $0x30] sm:$0xff]  ;;  %v51_v41 = vld [vmem:[%s828_s3 + $0x38] sm:$0xff] }
  0x86   :  { %v90_v43 = vpop.permute.xlu0 %89 }
  0x87   :  { %589 = vtanh.f32 %v213_v42  ;;  %v147_v44 = vpop.permute.xlu1 %146  ;;  %v111_v58 = vmul.f32 %v770_v32, %v90_v43  ;;  %v645_v42 = vmov 0.0  }
  0x88   :  { %v160_v54 = vadd.f32 %v147_v44, %v112_v50  ;;  %555 = vmatprep.subr.mxu1 %v645_v42  ;;  %571 = vmatprep.mubr.msk.f32.mxu1 %vm646_vm1, %v645_v42 }
  0x8a   :  { %v137_v45 = vpop.permute.xlu0 %136 }
  0x8b   :  { %v85_v46 = vpop.permute.xlu1 %84 }
  0x8c   :  { %v110_v55 = vmul.f32 %v770_v32, %v85_v46 }
  0x8e   :  { %v132_v47 = vpop.permute.xlu0 %131  ;;  %v158_v62 = vadd.f32 %v137_v45, %v110_v55 }
  0x8f   :  { %v142_v48 = vpop.permute.xlu1 %141 }
  0x90   :  { %v159_v63 = vadd.f32 %v142_v48, %v111_v58 }
  0x92   :  { %v70_v49 = vpop.permute.xlu0 %69 }
  0x93   :  { %v80_v51 = vpop.permute.xlu1 %79  ;;  %v107_v20 = vmul.f32 %v770_v32, %v70_v49 }
  0x94   :  { %v590_v52 = vpop.eup %589  ;;  %v109_v4 = vmul.f32 %v770_v32, %v80_v51 }
  0x95   :  { %527 = vmatprep.subr.mxu0 %v590_v52 }
  0x96   :  { %528 = vmatpush3.msra.mxu0 %v590_v52  ;;  %v157_v6 = vadd.f32 %v132_v47, %v109_v4 }
  0x97   :  { %v188_v53 = vpop.permute.xlu0 %187 }
  0x98   :  { %v204_v56 = vmul.f32 %v773_v37, %v188_v53  ;;  %v180_v57 = vpop.permute.xlu1 %179 }
  0x99   :  { %v202_v60 = vmul.f32 %v773_v37, %v180_v57 }
  0x9a   :  { %v212_v59 = vadd.f32 %v204_v56, %v160_v54 }
  0x9b   :  { %v184_v61 = vpop.permute.xlu0 %183  ;;  %v210_v1 = vadd.f32 %v202_v60, %v158_v62 }
  0x9c   :  { %591 = vtanh.f32 %v212_v59  ;;  %v203_v0 = vmul.f32 %v773_v37, %v184_v61 }
  0x9d   :  { %v75_v3 = vpop.permute.xlu1 %74 }
  0x9e   :  { %v211_v2 = vadd.f32 %v203_v0, %v159_v63  ;;  %v108_v10 = vmul.f32 %v770_v32, %v75_v3 }
  0x9f   :  { %v172_v8 = vpop.permute.xlu0 %171 }
  0xa0   :  { %593 = vtanh.f32 %v211_v2  ;;  %v200_v13 = vmul.f32 %v773_v37, %v172_v8 }
  0xa1   :  { %595 = vtanh.f32 %v210_v1 }
  0xa2   :  { %v176_v5 = vpop.permute.xlu1 %175 }
  0xa3   :  { %v201_v7 = vmul.f32 %v773_v37, %v176_v5  ;;  %v168_v16 = vpop.permute.xlu0 %167 }
  0xa4   :  { %v199_v22 = vmul.f32 %v773_v37, %v168_v16 }
  0xa5   :  { %v209_v9 = vadd.f32 %v201_v7, %v157_v6 }
  0xa7   :  { %597 = vtanh.f32 %v209_v9  ;;  %v127_v11 = vpop.permute.xlu1 %126  ;;  %v164_v24 = vpop.permute.xlu0 %163 }
  0xa8   :  { %v156_v14 = vadd.f32 %v127_v11, %v108_v10  ;;  %v198_v29 = vmul.f32 %v773_v37, %v164_v24  ;;  %v47_v37 = vld [vmem:[%s828_s3 + $0x18] sm:$0xff]  ;;  %v60_v10 = vld [vmem:[%s830_s5] sm:$0x3] }
  0xa9   :  { %v592_v12 = vpop.eup %591 }
  0xaa   :  { %529 = vmatprep.subr.mxu0 %v592_v12  ;;  %v208_v15 = vadd.f32 %v200_v13, %v156_v14 }
  0xab   :  { %530 = vmatpush3.msra.mxu0 %v592_v12  ;;  %v65_v17 = vpop.permute.xlu1 %64 }
  0xac   :  { %599 = vtanh.f32 %v208_v15  ;;  %v106_v25 = vmul.f32 %v770_v32, %v65_v17  ;;  %v45_v32 = vld [vmem:[%s828_s3 + $0x8] sm:$0xff]  ;;  %v255_v49 = vpop.permute.xlu0 %254 }
  0xad   :  { %v594_v18 = vpop.eup %593 }
  0xae   :  { %531 = vmatprep.subr.mxu0 %v594_v18  ;;  %v596_v19 = vpop.eup %595 }
  0xaf   :  { %532 = vmatpush3.msra.mxu0 %v594_v18  ;;  %v122_v21 = vpop.permute.xlu1 %121 }
  0xb0   :  { %533 = vmatprep.subr.mxu0 %v596_v19  ;;  %v155_v23 = vadd.f32 %v122_v21, %v107_v20  ;;  %v240_v55 = vpop.permute.xlu0 %239 }
  0xb1   :  { %534 = vmatpush3.msra.mxu0 %v596_v19 }
  0xb2   :  { %v207_v26 = vadd.f32 %v199_v22, %v155_v23 }
  0xb3   :  { %v117_v27 = vpop.permute.xlu1 %116 }
  0xb4   :  { %v598_v28 = vpop.eup %597  ;;  %601 = vtanh.f32 %v207_v26  ;;  %v154_v30 = vadd.f32 %v117_v27, %v106_v25  ;;  %v230_v62 = vpop.permute.xlu0 %229 }
  0xb5   :  { %535 = vmatprep.subr.mxu0 %v598_v28 }
  0xb6   :  { %v206_v31 = vadd.f32 %v198_v29, %v154_v30  ;;  %536 = vmatpush3.msra.mxu0 %v598_v28 }
  0xb7   :  { %v260_v43 = vpop.permute.xlu1 %259 }
  0xb8   :  { %603 = vtanh.f32 %v206_v31  ;;  %v403_v12 = vpop.permute.xlu0 %402 }
  0xb9   :  { %v600_v33 = vpop.eup %599 }
  0xba   :  { %537 = vmatprep.subr.mxu0 %v600_v33 }
  0xbb   :  { %538 = vmatpush3.msra.mxu0 %v600_v33  ;;  %v250_v47 = vpop.permute.xlu1 %249 }
  0xbf   :  { %v245_v52 = vpop.permute.xlu1 %244 }
  0xc1   :  { %v602_v34 = vpop.eup %601 }
  0xc2   :  { %539 = vmatprep.subr.mxu0 %v602_v34 }
  0xc3   :  { %540 = vmatpush3.msra.mxu0 %v602_v34  ;;  %v235_v60 = vpop.permute.xlu1 %234 }
  0xc5   :  { %v604_v35 = vpop.eup %603 }
  0xc6   :  { %541 = vmatprep.subr.mxu0 %v604_v35 }
  0xc7   :  { %542 = vmatpush3.msra.mxu0 %v604_v35  ;;  %v225_v1 = vpop.permute.xlu1 %224 }
  0xc8   :  { %544 = vmatmul.mubr.msk.f32.vlgmr.msra.gmra.mxu0 %vm262_vm0, %v45_v32 }
  0xc9   :  { %546 = vmatprep.mubr.msk.f32.mxu0 %vm262_vm0, %v46_v36 }
  0xcc   :  { %547 = vmatmul.mubr.msk.f32.gmra.mxu0 %vm262_vm0, %v47_v37 }
  0xcd   :  { %549 = vmatprep.mubr.msk.f32.mxu0 %vm262_vm0, %v48_v38 }
  0xd0   :  { %550 = vmatmul.mubr.msk.f32.gmra.mxu0 %vm262_vm0, %v49_v39 }
  0xd1   :  { %552 = vmatprep.mubr.msk.f32.mxu0 %vm262_vm0, %v50_v40 }
  0xd4   :  { %553 = vmatmul.mubr.msk.f32.gmra.mxu0 %vm262_vm0, %v51_v41 }
 0x188   :  { %v545_v44 = vpop.f32.mrf.mxu0 }
 0x189   :  { %v359_v0 = vadd.f32 %v545_v44, %v230_v62 }
 0x18a   :  { %v353_v45 = vpop.f32.mrf.mxu0 }
 0x18b   :  { %v354_v2 = vadd.f32 %v353_v45, %v225_v1 }
 0x18c   :  { %v548_v46 = vpop.f32.mrf.mxu0 }
 0x18d   :  { %v369_v61 = vadd.f32 %v548_v46, %v240_v55 }
 0x18e   :  { %v363_v48 = vpop.f32.mrf.mxu0 }
 0x18f   :  { %v364_v63 = vadd.f32 %v363_v48, %v235_v60 }
 0x190   :  { %v551_v50 = vpop.f32.mrf.mxu0 }
 0x191   :  { %v379_v57 = vadd.f32 %v551_v50, %v250_v47 }
 0x192   :  { %v373_v51 = vpop.f32.mrf.mxu0 }
 0x193   :  { %v374_v59 = vadd.f32 %v373_v51, %v245_v52 }
 0x194   :  { %v554_v53 = vpop.f32.mrf.mxu0 }
 0x195   :  { %v389_v54 = vadd.f32 %v554_v53, %v260_v43 }
 0x196   :  { %v383_v56 = vpop.f32.mrf.mxu0 }
 0x197   :  { %605 = vtanh.f32 %v389_v54  ;;  %v384_v58 = vadd.f32 %v383_v56, %v255_v49 }
 0x199   :  { %607 = vtanh.f32 %v384_v58 }
 0x19a   :  { %609 = vtanh.f32 %v379_v57 }
 0x19b   :  { %611 = vtanh.f32 %v374_v59 }
 0x19c   :  { %613 = vtanh.f32 %v369_v61 }
 0x19d   :  { %615 = vtanh.f32 %v364_v63 }
 0x19e   :  { %617 = vtanh.f32 %v359_v0 }
 0x19f   :  { %619 = vtanh.f32 %v354_v2 }
 0x1a4   :  { %v606_v3 = vpop.eup %605 }
 0x1a5   :  { %556 = vmatpush3.msra.mxu1 %v606_v3 }
 0x1a6   :  { %v608_v4 = vpop.eup %607  ;;  %557 = vmatprep.subr.mxu1 %v645_v42 }
 0x1a7   :  { %558 = vmatpush3.msra.mxu1 %v608_v4  ;;  %v610_v5 = vpop.eup %609 }
 0x1a8   :  { %559 = vmatprep.subr.mxu1 %v645_v42  ;;  %v612_v6 = vpop.eup %611 }
 0x1a9   :  { %560 = vmatpush3.msra.mxu1 %v610_v5  ;;  %v614_v7 = vpop.eup %613 }
 0x1aa   :  { %561 = vmatprep.subr.mxu1 %v645_v42  ;;  %v616_v8 = vpop.eup %615 }
 0x1ab   :  { %562 = vmatpush3.msra.mxu1 %v612_v6  ;;  %v618_v9 = vpop.eup %617 }
 0x1ac   :  { %563 = vmatprep.subr.mxu1 %v645_v42  ;;  %v620_v11 = vpop.eup %619 }
 0x1ad   :  { %564 = vmatpush3.msra.mxu1 %v614_v7 }
 0x1ae   :  { %565 = vmatprep.subr.mxu1 %v645_v42 }
 0x1af   :  { %566 = vmatpush3.msra.mxu1 %v616_v8 }
 0x1b0   :  { %567 = vmatprep.subr.mxu1 %v645_v42 }
 0x1b1   :  { %568 = vmatpush3.msra.mxu1 %v618_v9 }
 0x1b2   :  { %569 = vmatprep.subr.mxu1 %v645_v42 }
 0x1b3   :  { %570 = vmatpush3.msra.mxu1 %v620_v11 }
 0x1b4   :  { %572 = vmatmul.mubr.msk.f32.vlgmr.msra.gmra.mxu1 %vm262_vm0, %v60_v10 }
 0x274   :  { %v474_v13 = vpop.f32.mrf.mxu1 }
 0x275   :  { %v475_v14 = vadd.f32 %v474_v13, %v403_v12 }
 0x276   :  { %v573_v15 = vpop.f32.mrf.mxu1 }
 0x277   :  { %478 = vst [vmem:[#allocation2] sm:$0x3] %v475_v14 }
 0x278   :  { %632 = shalt.err (!%p629_p4)
}
 0x279   :  { %488 = dma.vmem_to_hbm [thread:$0]  %s486_s18, 32, %s832_s7, [#allocation3]  }
 0x27a   :  { %641 = dma.done.wait [#allocation3], 32  }
 0x27b   :  { %642 = vsyncadd [#allocation3], 4294967264 }
 0x27c   :  { %492 = vsyncpa [#allocation3], 1 }

</bundles_post_ra>
